<compile_context>
chip_gen: v6e
topology: v6e:2x2x1
jax: 0.10.0
libtpu: 0.0.40
codegen_flags: <defaults>
</compile_context>

<pallas_src>
import math
from functools import partial

import jax
import jax.numpy as jnp
from jax.experimental import pallas as pl
from jax.experimental.pallas import tpu as pltpu


def _gaussian_1d(size, std):
    """Matches torch: 1/(std*sqrt(2*pi)) * exp(-((x - mean) / (2*std))**2)."""
    x = jnp.arange(size, dtype=jnp.float32)
    mean = (size - 1) / 2.0
    return (1.0 / (std * math.sqrt(2.0 * math.pi))) * jnp.exp(
        -(((x - mean) / (2.0 * std)) ** 2)
    )


def make_gaussian_taps(kernel_size, sigma, dim=2):
    """Per-axis normalized 1-D taps; their outer product equals the module's
    normalized 2-D kernel (up to fp reassociation)."""
    if isinstance(kernel_size, (int, float)):
        kernel_size = [int(kernel_size)] * dim
    if isinstance(sigma, (int, float)):
        sigma = [float(sigma)] * dim
    taps = []
    for size, std in zip(kernel_size, sigma):
        g = _gaussian_1d(size, std)
        taps.append((g / jnp.sum(g)).astype(jnp.float32))
    return taps


def make_gaussian_weight(channels, kernel_size, sigma, dim=2):
    """Exact replica of the PyTorch buffer construction: (C, 1, KH, KW)."""
    if isinstance(kernel_size, (int, float)):
        kernel_size = [int(kernel_size)] * dim
    if isinstance(sigma, (int, float)):
        sigma = [float(sigma)] * dim
    grids = jnp.meshgrid(
        *[jnp.arange(s, dtype=jnp.float32) for s in kernel_size], indexing="ij"
    )
    kernel = jnp.ones((), dtype=jnp.float32)
    for size, std, mgrid in zip(kernel_size, sigma, grids):
        mean = (size - 1) / 2.0
        kernel = kernel * (
            1.0 / (std * math.sqrt(2.0 * math.pi))
            * jnp.exp(-(((mgrid - mean) / (2.0 * std)) ** 2))
        )
    kernel = kernel / jnp.sum(kernel)
    kernel = kernel.reshape((1, 1) + kernel.shape)
    return jnp.tile(kernel, (channels,) + (1,) * (kernel.ndim - 1))


def _gauss_sep_kernel(wv_ref, wh_ref, x_ref, o_ref, *, kh, kw, ho, wo):
    # wv_ref: (KH,) f32 SMEM, wh_ref: (KW,) f32 SMEM,
    # x_ref: (B, H, W) VMEM block, o_ref: (B, Ho, Wo) VMEM block.
    x = x_ref[...].astype(jnp.float32)

    # Horizontal (lane-axis) pass: KW taps; SMEM scalar -> vreg broadcast mul.
    tmp = wh_ref[0] * x[:, :, 0:wo]
    for j in range(1, kw):
        tmp = tmp + wh_ref[j] * x[:, :, j:j + wo]

    # Vertical (sublane-axis) pass: KH taps; sublane shifts are cheap.
    acc = wv_ref[0] * tmp[:, 0:ho, :]
    for i in range(1, kh):
        acc = acc + wv_ref[i] * tmp[:, i:i + ho, :]

    o_ref[...] = acc.astype(o_ref.dtype)


def _pick_nc_block(nc, h, w, ho, wo, itemsize):
    # Per-slab VMEM: double-buffered input+output blocks plus f32 temporaries.
    slab_bytes = 2 * (h * w + ho * wo) * itemsize + (h * wo + ho * wo) * 4
    budget = 12 * 1024 * 1024
    cap = max(1, budget // slab_bytes)
    cap = min(cap, nc)
    if nc >= 2:
        cap = min(cap, nc // 2)  # keep >= 2 grid blocks => both v7x TCs busy
    cap = max(1, cap)
    nc_blk = 1
    for d in range(1, int(cap) + 1):  # largest divisor of nc not exceeding cap
        if nc % d == 0:
            nc_blk = d
    return nc_blk


def gaussian_smoothing_2d(x, wv, wh):
    """x: (N, C, H, W); wv: (KH,), wh: (KW,). VALID depthwise Gaussian conv."""
    n, c, h, w = x.shape
    kh, kw = int(wv.shape[0]), int(wh.shape[0])
    ho, wo = h - kh + 1, w - kw + 1
    nc = n * c
    x3 = x.reshape(nc, h, w)

    nc_blk = _pick_nc_block(nc, h, w, ho, wo, jnp.dtype(x.dtype).itemsize)
    grid = (nc // nc_blk,)

    kern = partial(_gauss_sep_kernel, kh=kh, kw=kw, ho=ho, wo=wo)
    out3 = pl.pallas_call(
        kern,
        out_shape=jax.ShapeDtypeStruct((nc, ho, wo), x.dtype),
        grid=grid,
        in_specs=[
            pl.BlockSpec(memory_space=pltpu.MemorySpace.SMEM),  # vertical taps
            pl.BlockSpec(memory_space=pltpu.MemorySpace.SMEM),  # horizontal taps
            pl.BlockSpec((nc_blk, h, w), lambda b: (b, 0, 0)),
        ],
        out_specs=pl.BlockSpec((nc_blk, ho, wo), lambda b: (b, 0, 0)),
        compiler_params=pltpu.CompilerParams(
            dimension_semantics=("parallel",),
            vmem_limit_bytes=32 * 1024 * 1024,
        ),
    )(wv.astype(jnp.float32), wh.astype(jnp.float32), x3)

    return out3.reshape(n, c, ho, wo)


def _reference(x, weight):
    c = x.shape[1]
    return jax.lax.conv_general_dilated(
        x, weight,
        window_strides=(1, 1),
        padding="VALID",
        dimension_numbers=("NCHW", "OIHW", "NCHW"),
        feature_group_count=c,
    )


if __name__ == "__main__":
    channels = 4
    kernel_size = 5
    sigma = 1.0

    key = jax.random.PRNGKey(0)
    x = jax.random.normal(key, (2, channels, 16, 16), dtype=jnp.float32)

    wv, wh = make_gaussian_taps(kernel_size, sigma, dim=2)
    weight = make_gaussian_weight(channels, kernel_size, sigma, dim=2)

    out = gaussian_smoothing_2d(x, wv, wh)
    out = jax.block_until_ready(out)

    ref = _reference(x, weight.astype(x.dtype))
    assert out.shape == ref.shape, (out.shape, ref.shape)
    assert jnp.allclose(out, ref, atol=1e-5, rtol=1e-5), float(
        jnp.max(jnp.abs(out - ref))
    )

    print("KERNEL_OK")
</pallas_src>

<mosaic_0001>
module attributes {stable_mosaic.version = 11 : i64} {
  func.func @_gauss_sep_kernel(%arg0: i32, %arg1: memref<5xf32, #tpu.memory_space<smem>>, %arg2: memref<5xf32, #tpu.memory_space<smem>>, %arg3: memref<4x16x16xf32, #tpu.memory_space<vmem>>, %arg4: memref<4x12x12xf32, #tpu.memory_space<vmem>>) attributes {dimension_semantics = [#tpu.dimension_semantics<parallel>], iteration_bounds = array<i64: 2>, scalar_prefetch = 0 : i64, scratch_operands = 0 : i64, tpu.core_type = #tpu.core_type<tc>, window_params = [{transform_indices = @transform_0, window_bounds = array<i64: 5>}, {transform_indices = @transform_1, window_bounds = array<i64: 5>}, {transform_indices = @transform_2, window_bounds = array<i64: 4, 16, 16>}, {transform_indices = @transform_3, window_bounds = array<i64: 4, 12, 12>}]} {
    %c0 = arith.constant 0 : index
    %c0_0 = arith.constant 0 : index
    %c0_1 = arith.constant 0 : index
    %0 = vector.load %arg3[%c0, %c0_0, %c0_1] : memref<4x16x16xf32, #tpu.memory_space<vmem>>, vector<4x16x16xf32>
    %c0_2 = arith.constant 0 : index
    %1 = memref.load %arg2[%c0_2] : memref<5xf32, #tpu.memory_space<smem>>
    %2 = vector.extract_strided_slice %0 {offsets = [0, 0, 0], sizes = [4, 16, 12], strides = [1, 1, 1]} : vector<4x16x16xf32> to vector<4x16x12xf32>
    %3 = vector.broadcast %1 : f32 to vector<4x16x12xf32>
    %4 = arith.mulf %3, %2 : vector<4x16x12xf32>
    %c1 = arith.constant 1 : index
    %5 = memref.load %arg2[%c1] : memref<5xf32, #tpu.memory_space<smem>>
    %6 = vector.extract_strided_slice %0 {offsets = [0, 0, 1], sizes = [4, 16, 12], strides = [1, 1, 1]} : vector<4x16x16xf32> to vector<4x16x12xf32>
    %7 = vector.broadcast %5 : f32 to vector<4x16x12xf32>
    %8 = arith.mulf %7, %6 : vector<4x16x12xf32>
    %9 = arith.addf %4, %8 : vector<4x16x12xf32>
    %c2 = arith.constant 2 : index
    %10 = memref.load %arg2[%c2] : memref<5xf32, #tpu.memory_space<smem>>
    %11 = vector.extract_strided_slice %0 {offsets = [0, 0, 2], sizes = [4, 16, 12], strides = [1, 1, 1]} : vector<4x16x16xf32> to vector<4x16x12xf32>
    %12 = vector.broadcast %10 : f32 to vector<4x16x12xf32>
    %13 = arith.mulf %12, %11 : vector<4x16x12xf32>
    %14 = arith.addf %9, %13 : vector<4x16x12xf32>
    %c3 = arith.constant 3 : index
    %15 = memref.load %arg2[%c3] : memref<5xf32, #tpu.memory_space<smem>>
    %16 = vector.extract_strided_slice %0 {offsets = [0, 0, 3], sizes = [4, 16, 12], strides = [1, 1, 1]} : vector<4x16x16xf32> to vector<4x16x12xf32>
    %17 = vector.broadcast %15 : f32 to vector<4x16x12xf32>
    %18 = arith.mulf %17, %16 : vector<4x16x12xf32>
    %19 = arith.addf %14, %18 : vector<4x16x12xf32>
    %c4 = arith.constant 4 : index
    %20 = memref.load %arg2[%c4] : memref<5xf32, #tpu.memory_space<smem>>
    %21 = vector.extract_strided_slice %0 {offsets = [0, 0, 4], sizes = [4, 16, 12], strides = [1, 1, 1]} : vector<4x16x16xf32> to vector<4x16x12xf32>
    %22 = vector.broadcast %20 : f32 to vector<4x16x12xf32>
    %23 = arith.mulf %22, %21 : vector<4x16x12xf32>
    %24 = arith.addf %19, %23 : vector<4x16x12xf32>
    %c0_3 = arith.constant 0 : index
    %25 = memref.load %arg1[%c0_3] : memref<5xf32, #tpu.memory_space<smem>>
    %26 = vector.extract_strided_slice %24 {offsets = [0, 0, 0], sizes = [4, 12, 12], strides = [1, 1, 1]} : vector<4x16x12xf32> to vector<4x12x12xf32>
    %27 = vector.broadcast %25 : f32 to vector<4x12x12xf32>
    %28 = arith.mulf %27, %26 : vector<4x12x12xf32>
    %c1_4 = arith.constant 1 : index
    %29 = memref.load %arg1[%c1_4] : memref<5xf32, #tpu.memory_space<smem>>
    %30 = vector.extract_strided_slice %24 {offsets = [0, 1, 0], sizes = [4, 12, 12], strides = [1, 1, 1]} : vector<4x16x12xf32> to vector<4x12x12xf32>
    %31 = vector.broadcast %29 : f32 to vector<4x12x12xf32>
    %32 = arith.mulf %31, %30 : vector<4x12x12xf32>
    %33 = arith.addf %28, %32 : vector<4x12x12xf32>
    %c2_5 = arith.constant 2 : index
    %34 = memref.load %arg1[%c2_5] : memref<5xf32, #tpu.memory_space<smem>>
    %35 = vector.extract_strided_slice %24 {offsets = [0, 2, 0], sizes = [4, 12, 12], strides = [1, 1, 1]} : vector<4x16x12xf32> to vector<4x12x12xf32>
    %36 = vector.broadcast %34 : f32 to vector<4x12x12xf32>
    %37 = arith.mulf %36, %35 : vector<4x12x12xf32>
    %38 = arith.addf %33, %37 : vector<4x12x12xf32>
    %c3_6 = arith.constant 3 : index
    %39 = memref.load %arg1[%c3_6] : memref<5xf32, #tpu.memory_space<smem>>
    %40 = vector.extract_strided_slice %24 {offsets = [0, 3, 0], sizes = [4, 12, 12], strides = [1, 1, 1]} : vector<4x16x12xf32> to vector<4x12x12xf32>
    %41 = vector.broadcast %39 : f32 to vector<4x12x12xf32>
    %42 = arith.mulf %41, %40 : vector<4x12x12xf32>
    %43 = arith.addf %38, %42 : vector<4x12x12xf32>
    %c4_7 = arith.constant 4 : index
    %44 = memref.load %arg1[%c4_7] : memref<5xf32, #tpu.memory_space<smem>>
    %45 = vector.extract_strided_slice %24 {offsets = [0, 4, 0], sizes = [4, 12, 12], strides = [1, 1, 1]} : vector<4x16x12xf32> to vector<4x12x12xf32>
    %46 = vector.broadcast %44 : f32 to vector<4x12x12xf32>
    %47 = arith.mulf %46, %45 : vector<4x12x12xf32>
    %48 = arith.addf %43, %47 : vector<4x12x12xf32>
    %c0_8 = arith.constant 0 : index
    %c0_9 = arith.constant 0 : index
    %c0_10 = arith.constant 0 : index
    %49 = vector.load %arg4[%c0_8, %c0_9, %c0_10] : memref<4x12x12xf32, #tpu.memory_space<vmem>>, vector<4x12x12xf32>
    tpu.vector_store %arg4[%c0_8, %c0_9, %c0_10], %48 {strides = array<i32>} : memref<4x12x12xf32, #tpu.memory_space<vmem>>, vector<4x12x12xf32>,
    return
  }
  func.func @transform_0(%arg0: i32) -> i32 {
    %c0_i32 = arith.constant 0 : i32
    %c0_i32_0 = arith.constant 0 : i32
    return %c0_i32 : i32
  }
  func.func @transform_1(%arg0: i32) -> i32 {
    %c0_i32 = arith.constant 0 : i32
    %c0_i32_0 = arith.constant 0 : i32
    return %c0_i32 : i32
  }
  func.func @transform_2(%arg0: i32) -> (i32, i32, i32) {
    %c0_i32 = arith.constant 0 : i32
    %c0_i32_0 = arith.constant 0 : i32
    %c0_i32_1 = arith.constant 0 : i32
    return %arg0, %c0_i32, %c0_i32_0 : i32, i32, i32
  }
  func.func @transform_3(%arg0: i32) -> (i32, i32, i32) {
    %c0_i32 = arith.constant 0 : i32
    %c0_i32_0 = arith.constant 0 : i32
    %c0_i32_1 = arith.constant 0 : i32
    return %arg0, %c0_i32, %c0_i32_0 : i32, i32, i32
  }
}

</mosaic_0001>

<bundles_post_ra>
// kernel: tpu_custom_call.1
= control target key start
LH: loop header
LB: loop body
LE: loop exit
PB: predicated region body
PF: predicated region fallthrough
CT: control target
= control target key end

     0   :  { %8 = vsyncpa [#allocation4], 0  ;;  %s1253_s0 = inlined_call_operand.hbm [shape: f32[5], index: 0, kind: input, shape index: {}]   ;;  %s1254_s1 = inlined_call_operand.vmem [shape: f32[5], index: 1, kind: input, shape index: {}]   ;;  %s1255_s2 = inlined_call_operand.hbm [shape: f32[8,16,16], index: 2, kind: input, shape index: {}]   ;;  %s1256_s3 = inlined_call_operand.vmem [shape: f32[8,12,12], index: 3, kind: output, shape index: {}]  }
   0x1   :  { %9 = vsyncpa [#allocation5], 0 }
   0x2   :  { %10 = vsyncpa [#allocation3], 0 }
   0x3   :  { %12 = vsyncpa [#allocation3 + $0x1], 0  ;;  %s963_s12 = smov 0   ;;  %s965_s13 = smov 0  }
   0x4   :  { %s967_s14 = smov 0   ;;  %s969_s15 = smov 0  }
   0x5 LB: > { %s740_s16 = sadd.s32 4294967295, %s932_s15   ;;  %s983_s17 = sadd.s32 1, %s932_s15   ;;  %s932_s15 = sphi %s969_s15, %s1272_s15   ;;  %s928_s14 = sphi %s967_s14, %s1271_s14   ;;  %s924_s13 = sphi %s965_s13, %s1270_s13   ;;  %s920_s12 = sphi %s963_s12, %s1269_s12  }
   0x6   : > { %s64_s18 = ssub.s32 %s932_s15, %s983_s17  ;;  %s67_s19 = sadd.s32 1, %s928_s14 }
   0x7   : > { %p65_p0 = scmp.eq.s32.totalorder %s64_s18, 0  ;;  %p74_p1 = scmp.ne.s32.totalorder %s928_s14, %s924_s13 }
   0x8   : > { %p75_p2 = scmp.eq.s32.totalorder %s932_s15, 0  ;;  %p80_p3 = scmp.ne.s32.totalorder %s924_s13, %s920_s12 }
   0x9   : > { %s993_s20 = scalar_select %p65_p0, %s928_s14, %s67_s19  }
   0xa   : > { %p76_p4 = por %p75_p2, %p74_p1  ;;  %p997_p5 = scmp.eq.s32.totalorder %s740_s16, 0 }
   0xb   : > { %p742_p6 = scmp.ge.s32.totalorder %s932_s15, 1  ;;  %p117_p7 = scmp.lt.s32.totalorder %s932_s15, 3 }
   0xc   : > { %s1261_s21 = scalar_select %p997_p5, 1, 0 }
   0xd   : > { %p1005_p8 = por %p997_p5, %p80_p3  ;;  %p1009_p9 = pnand %p742_p6, %p117_p7 }
   0xe   : > { %p793_p10 = scmp.lt.s32.totalorder %s932_s15, 2  ;;  %s139_s26 = sshll.u32 %s1254_s1, 4  ;;  %s140_s26 = int_to_ptr.vmem [resolvable:$true] %s139_s26 }
   0xf   : > { %s1262_s22 = scalar_select %p1005_p8, 1, 0 }
  0x10   : > { %s1263_s23 = scalar_select %p1009_p9, 1, 0 }
  0x11   : > { %p780_p11 = pneg %p1009_p9  ;;  %p1019_p12 = pnand %p793_p10, %p76_p4 }
  0x12   : > { %s150_s29 = sand.u32 1, %s928_s14   ;;  %s934_s30 = smov [#allocation2]  }
  0x13   : > { %p1025_p13 = pnand %p780_p11, %p997_p5  ;;  %s847_s6 = scalar_lea.vmem %s140_s26, 16 }
  0x14   : > { %p848_p0 = scmp.ne.s32.totalorder %s140_s26, %s847_s6  ;;  %p855_p4 = scmp.lt.s32.totalorder %s140_s26, %s140_s26 }
  0x15   : > { %783 = dma.hbm_to_smem (!%p1025_p13), %s1253_s0, 16, %s934_s30, [#allocation4]  }
  0x16   : > { %p849_p1 = pneg %p1025_p13  ;;  %p856_p6 = scmp.lt.s32.totalorder %s847_s6, %s847_s6 }
  0x18   : > { %p850_p2 = pnand %p849_p1, %p848_p0  ;;  %p857_p7 = por %p856_p6, %p855_p4 }
  0x1a   : > { %p851_p3 = pneg %p850_p2 }
  0x1c   : > { %p858_p10 = pnand %p857_p7, %p851_p3 }
  0x1e   : > { %861 = shalt.err (!%p858_p10)
}
  0x1f   : > { %s935_s7 = smov [#allocation6]   ;;  %s746_s8 = sshll.u32 %s150_s29, 6 }
  0x20   : > { %786 = dma.vmem_to_smem (!%p1025_p13), %s140_s26, 16, %s935_s7, [#allocation5]  }
  0x21   : > { %s768_s9 = sshll.u32 %s932_s15, 10  ;;  %s154_s18 = scalar_lea.vmem [#allocation7], %s746_s8 }
  0x22   : > { %s1043_s12 = scalar_lea.hbm %s1255_s2, %s768_s9  ;;  %s162_s19 = sshll.u32 %s154_s18, 4  ;;  %s1045_s19 = int_to_ptr.vmem [resolvable:$true] %s162_s19 }
  0x23   : > { %s1047_s24 = scalar_lea.sflag [#allocation3], %s150_s29  ;;  %s862_s25 = scalar_lea.hbm %s1043_s12, 1024 }
  0x24   : > { %p863_p11 = scmp.ne.s32.totalorder %s1043_s12, %s862_s25  ;;  %p864_p13 = pneg %p1019_p12 }
  0x25   : > { %s867_s30 = scalar_lea.hbm %s1255_s2, 2048  ;;  %p868_p2 = scmp.lt.s32.totalorder %s1043_s12, %s1255_s2 }
  0x26   : > { %p865_p0 = pnand %p864_p13, %p863_p11  ;;  %p869_p3 = scmp.lt.s32.totalorder %s867_s30, %s862_s25 }
  0x28   : > { %p866_p1 = pneg %p865_p0  ;;  %p870_p4 = por %p869_p3, %p868_p2 }
  0x2a   : > { %p871_p6 = pnand %p870_p4, %p866_p1 }
  0x2c   : > { %874 = shalt.err (!%p871_p6)
}
  0x2d   : > { %s875_s29 = scalar_lea.vmem %s1045_s19, 1024  ;;  %s936_s6 = smov [#allocation7]  }
  0x2e   : > { %p876_p7 = scmp.ne.s32.totalorder %s1045_s19, %s875_s29  ;;  %s880_s7 = sshll.u32 %s936_s6, 4  ;;  %s881_s7 = int_to_ptr.vmem [resolvable:$false] %s880_s7 }
  0x2f   : > { %s882_s8 = scalar_lea.vmem %s881_s7, 2048  ;;  %p883_p0 = scmp.lt.s32.totalorder %s1045_s19, %s881_s7 }
  0x30   : > { %p878_p10 = pnand %p876_p7, %p864_p13  ;;  %p884_p8 = scmp.lt.s32.totalorder %s882_s8, %s875_s29 }
  0x32   : > { %p879_p11 = pneg %p878_p10  ;;  %p885_p5 = por %p884_p8, %p883_p0 }
  0x34   : > { %p886_p9 = pnand %p885_p5, %p879_p11 }
  0x36   : > { %889 = shalt.err (!%p886_p9)
}
  0x37   : > { %s937_s9 = smov 128   ;;  %s938_s10 = smov 8  }
  0x38   : > { %790 = dma.hbm_to_vmem [thread:$0]  (!%p1019_p12), %s1043_s12, 1024, %s1045_s19, %s1047_s24, %s937_s9, %s937_s9, %s938_s10  }
  0x39   : > { %p1266_p13 = scmp.ne.s32.totalorder %s1263_s23, 0 }
  0x3a   : > { %p1267_p1 = scmp.ne.s32.totalorder (!%p1266_p13), %s1261_s21, 0 }
  0x3b   : > { %174 = sbr.rel (%p1266_p13) target bundleno = 285 (0x11d), region = 32 }
  0x40   : > { %907 = dma.done.wait (%p1267_p1), [#allocation4], 16  }
  0x41   : > { %909 = vsyncadd (%p1267_p1), [#allocation4], 4294967280 }
  0x42   : > { %911 = dma.done.wait (%p1267_p1), [#allocation5], 16  }
  0x43   : > { %913 = vsyncadd (%p1267_p1), [#allocation5], 4294967280  ;;  %s184_s11 = sand.u32 1, %s924_s13   ;;  %p1268_p5 = scmp.ne.s32.totalorder %s1262_s22, 0 }
  0x44   : > { %s753_s27 = sshll.u32 %s184_s11, 6  ;;  %s185_s12 = scalar_lea.sflag [#allocation3], %s184_s11 }
  0x45   : > { %s188_s18 = scalar_lea.vmem [#allocation7], %s753_s27 }
  0x46   : > { %915 = dma.done.wait (%p1268_p5), %s185_s12, 1024  }
  0x47   : > { %917 = vsyncadd (%p1268_p5), %s185_s12, 4294966272 }
  0x48   : > { %193 = sfence }
  0x49   : > { %s757_s23 = sld [smem:[#allocation6 + $0x1]]  ;;  %v1083_v0 = vld [vmem:[%s188_s18 + $0x10] sm:$0xff]  ;;  %v1085_v1 = vld [vmem:[%s188_s18] sm:$0xff]  ;;  %v1087_v3 = vld [vmem:[%s188_s18 + $0x18] sm:$0xff]  ;;  %s939_s19 = smov 127   ;;  %vm467_vm0 = vcmask 1046528  }
  0x4a   : > { %v1089_v4 = vld [vmem:[%s188_s18 + $0x8] sm:$0xff]  ;;  %s758_s21 = sld [smem:[#allocation6 + $0x2]]  ;;  %v1097_v10 = vld [vmem:[%s188_s18 + $0x20] sm:$0xff]  ;;  %v1103_v16 = vld [vmem:[%s188_s18 + $0x38] sm:$0xff]  ;;  %s940_s22 = smov 126   ;;  %vm514_vm1 = vcmask 1045504  }
  0x4b   : > { %v1095_v9 = vld [vmem:[%s188_s18 + $0x28] sm:$0xff]  ;;  %v1105_v17 = vld [vmem:[%s188_s18 + $0x30] sm:$0xff]  ;;  %s759_s24 = sld [smem:[#allocation6 + $0x3]]  ;;  %s941_s25 = smov 125   ;;  %vm561_vm2 = vcmask 1044480   ;;  %vm608_vm3 = vcmask 1043456  }
  0x4c   : > { %s760_s26 = sld [smem:[#allocation6 + $0x4]]  ;;  %s942_s28 = smov 124   ;;  %vm639_vm4 = vcmask 93184   ;;  %vm637_vm5 = vcmask 97280  }
  0x4d   : > { %s229_s30 = sld [smem:[#allocation6]]  ;;  %s1151_s8 = sshll.u32 %s740_s16, 2 }
  0x4e   : > { %s439_s4 = sld [smem:[#allocation2]]  ;;  %p215_p8 = scmp.lt.s32.totalorder %s1151_s8, 7 }
  0x4f   : > { %v240_v2 = vstv %s757_s23  ;;  %s761_s5 = sld [smem:[#allocation2 + $0x1]] }
  0x50   : > { %v243_v5 = vmul.f32 %v240_v2, %v1083_v0  ;;  %v241_v6 = vmul.f32 %v240_v2, %v1085_v1  ;;  %v244_v7 = vmul.f32 %v240_v2, %v1087_v3  ;;  %v242_v8 = vmul.f32 %v240_v2, %v1089_v4  ;;  %s762_s29 = sld [smem:[#allocation2 + $0x2]]  ;;  %s1274_s8 = smov (!%p215_p8, %s1151_s8), 7 }
  0x51   : > { %v246_v11 = vmul.f32 %v240_v2, %v1095_v9  ;;  %v245_v12 = vmul.f32 %v240_v2, %v1097_v10  ;;  %v290_v13 = vstv %s758_s21  ;;  %v248_v18 = vmul.f32 %v240_v2, %v1103_v16  ;;  %s763_s6 = sld [smem:[#allocation2 + $0x3]]  ;;  %s769_s15 = sshll.u32 %s1274_s8, 4 }
  0x52   : > { %261 = vrot.lane.b32.xlu1 %v243_v5, %s939_s19  ;;  %257 = vrot.lane.b32.xlu0 %v241_v6, %s939_s19  ;;  %v292_v14 = vmul.f32 %v290_v13, %v1089_v4  ;;  %v291_v15 = vmul.f32 %v290_v13, %v1085_v1  ;;  %v247_v19 = vmul.f32 %v240_v2, %v1105_v17  ;;  %v340_v24 = vstv %s759_s24  ;;  %s764_s7 = sld [smem:[#allocation2 + $0x4]]  ;;  %s1181_s10 = scalar_lea.vmem %s1256_s3, %s769_s15 }
  0x53   : > { %v294_v20 = vmul.f32 %v290_v13, %v1087_v3  ;;  %v293_v21 = vmul.f32 %v290_v13, %v1083_v0  ;;  %v296_v22 = vmul.f32 %v290_v13, %v1095_v9  ;;  %v295_v23 = vmul.f32 %v290_v13, %v1097_v10 }
  0x54   : > { %v342_v25 = vmul.f32 %v340_v24, %v1089_v4  ;;  %v341_v26 = vmul.f32 %v340_v24, %v1085_v1  ;;  %v298_v27 = vmul.f32 %v290_v13, %v1103_v16  ;;  %v297_v28 = vmul.f32 %v290_v13, %v1105_v17 }
  0x55   : > { %v344_v29 = vmul.f32 %v340_v24, %v1087_v3  ;;  %v343_v30 = vmul.f32 %v340_v24, %v1083_v0  ;;  %v346_v31 = vmul.f32 %v340_v24, %v1095_v9  ;;  %v345_v32 = vmul.f32 %v340_v24, %v1097_v10 }
  0x56   : > { %263 = vrot.lane.b32.xlu1 %v244_v7, %s939_s19  ;;  %259 = vrot.lane.b32.xlu0 %v242_v8, %s939_s19  ;;  %v390_v33 = vstv %s760_s26  ;;  %v348_v36 = vmul.f32 %v340_v24, %v1103_v16  ;;  %v347_v37 = vmul.f32 %v340_v24, %v1105_v17  ;;  %v230_v60 = vstv %s229_s30 }
  0x57   : > { %v392_v34 = vmul.f32 %v390_v33, %v1089_v4  ;;  %v391_v35 = vmul.f32 %v390_v33, %v1085_v1  ;;  %v394_v38 = vmul.f32 %v390_v33, %v1087_v3  ;;  %v393_v39 = vmul.f32 %v390_v33, %v1083_v0 }
  0x58   : > { %v396_v40 = vmul.f32 %v390_v33, %v1095_v9  ;;  %v395_v41 = vmul.f32 %v390_v33, %v1097_v10  ;;  %v398_v42 = vmul.f32 %v390_v33, %v1103_v16  ;;  %v397_v43 = vmul.f32 %v390_v33, %v1105_v17 }
  0x59   : > { %v231_v63 = vmul.f32 %v230_v60, %v1085_v1  ;;  %v232_v2 = vmul.f32 %v230_v60, %v1089_v4  ;;  %v233_v7 = vmul.f32 %v230_v60, %v1083_v0  ;;  %v234_v8 = vmul.f32 %v230_v60, %v1087_v3 }
  0x5a   : > { %267 = vrot.lane.b32.xlu1 %v246_v11, %s939_s19  ;;  %265 = vrot.lane.b32.xlu0 %v245_v12, %s939_s19  ;;  %v236_v11 = vmul.f32 %v230_v60, %v1095_v9  ;;  %v1139_v4 = vstv %s439_s4  ;;  %v1143_v0 = vstv %s762_s29 }
  0x5b   : > { %v1145_v9 = vstv %s763_s6 }
  0x5e   : > { %309 = vrot.lane.b32.xlu1 %v292_v14, %s940_s22  ;;  %307 = vrot.lane.b32.xlu0 %v291_v15, %s940_s22  ;;  %v235_v14 = vmul.f32 %v230_v60, %v1097_v10  ;;  %v238_v15 = vmul.f32 %v230_v60, %v1103_v16 }
  0x62   : > { %271 = vrot.lane.b32.xlu1 %v248_v18, %s939_s19  ;;  %269 = vrot.lane.b32.xlu0 %v247_v19, %s939_s19  ;;  %v237_v18 = vmul.f32 %v230_v60, %v1105_v17 }
  0x66   : > { %313 = vrot.lane.b32.xlu1 %v294_v20, %s940_s22  ;;  %311 = vrot.lane.b32.xlu0 %v293_v21, %s940_s22  ;;  %v1141_v20 = vstv %s761_s5 }
  0x6a   : > { %317 = vrot.lane.b32.xlu1 %v296_v22, %s940_s22  ;;  %315 = vrot.lane.b32.xlu0 %v295_v23, %s940_s22  ;;  %v1147_v22 = vstv %s764_s7 }
  0x6e   : > { %359 = vrot.lane.b32.xlu1 %v342_v25, %s941_s25  ;;  %357 = vrot.lane.b32.xlu0 %v341_v26, %s941_s25 }
  0x72   : > { %321 = vrot.lane.b32.xlu1 %v298_v27, %s940_s22  ;;  %319 = vrot.lane.b32.xlu0 %v297_v28, %s940_s22 }
  0x76   : > { %363 = vrot.lane.b32.xlu1 %v344_v29, %s941_s25  ;;  %361 = vrot.lane.b32.xlu0 %v343_v30, %s941_s25 }
  0x7a   : > { %367 = vrot.lane.b32.xlu1 %v346_v31, %s941_s25  ;;  %365 = vrot.lane.b32.xlu0 %v345_v32, %s941_s25 }
  0x7e   : > { %409 = vrot.lane.b32.xlu1 %v392_v34, %s942_s28  ;;  %407 = vrot.lane.b32.xlu0 %v391_v35, %s942_s28 }
  0x82   : > { %371 = vrot.lane.b32.xlu1 %v348_v36, %s941_s25  ;;  %369 = vrot.lane.b32.xlu0 %v347_v37, %s941_s25 }
  0x86   : > { %413 = vrot.lane.b32.xlu1 %v394_v38, %s942_s28  ;;  %411 = vrot.lane.b32.xlu0 %v393_v39, %s942_s28 }
  0x8a   : > { %417 = vrot.lane.b32.xlu1 %v396_v40, %s942_s28  ;;  %415 = vrot.lane.b32.xlu0 %v395_v41, %s942_s28 }
  0x8e   : > { %421 = vrot.lane.b32.xlu1 %v398_v42, %s942_s28  ;;  %419 = vrot.lane.b32.xlu0 %v397_v43, %s942_s28 }
  0xc4   : > { %v262_v44 = vpop.permute.xlu1 %261  ;;  %v258_v45 = vpop.permute.xlu0 %257 }
  0xc5   : > { %v281_v12 = vadd.f32 %v258_v45, %v231_v63  ;;  %v283_v10 = vadd.f32 %v262_v44, %v233_v7 }
  0xc8   : > { %v264_v46 = vpop.permute.xlu1 %263  ;;  %v260_v47 = vpop.permute.xlu0 %259 }
  0xc9   : > { %v282_v13 = vadd.f32 %v260_v47, %v232_v2  ;;  %v284_v23 = vadd.f32 %v264_v46, %v234_v8 }
  0xcc   : > { %v268_v48 = vpop.permute.xlu1 %267  ;;  %v266_v49 = vpop.permute.xlu0 %265 }
  0xcd   : > { %v286_v16 = vadd.f32 %v268_v48, %v236_v11  ;;  %v285_v25 = vadd.f32 %v266_v49, %v235_v14 }
  0xd0   : > { %v310_v50 = vpop.permute.xlu1 %309  ;;  %v308_v51 = vpop.permute.xlu0 %307 }
  0xd1   : > { %v332_v3 = vadd.f32 %v310_v50, %v282_v13  ;;  %v331_v21 = vadd.f32 %v308_v51, %v281_v12 }
  0xd4   : > { %v272_v52 = vpop.permute.xlu1 %271  ;;  %v270_v53 = vpop.permute.xlu0 %269 }
  0xd5   : > { %v288_v26 = vadd.f32 %v272_v52, %v238_v15  ;;  %v287_v27 = vadd.f32 %v270_v53, %v237_v18 }
  0xd8   : > { %v314_v54 = vpop.permute.xlu1 %313  ;;  %v312_v55 = vpop.permute.xlu0 %311 }
  0xd9   : > { %v334_v28 = vadd.f32 %v314_v54, %v284_v23  ;;  %v333_v31 = vadd.f32 %v312_v55, %v283_v10 }
  0xdc   : > { %v318_v56 = vpop.permute.xlu1 %317  ;;  %v316_v57 = vpop.permute.xlu0 %315 }
  0xdd   : > { %v336_v32 = vadd.f32 %v318_v56, %v286_v16  ;;  %v335_v35 = vadd.f32 %v316_v57, %v285_v25 }
  0xe0   : > { %v360_v58 = vpop.permute.xlu1 %359  ;;  %v358_v59 = vpop.permute.xlu0 %357 }
  0xe1   : > { %v382_v17 = vadd.f32 %v360_v58, %v332_v3  ;;  %v381_v24 = vadd.f32 %v358_v59, %v331_v21 }
  0xe4   : > { %v322_v61 = vpop.permute.xlu1 %321  ;;  %v320_v62 = vpop.permute.xlu0 %319 }
  0xe5   : > { %v338_v36 = vadd.f32 %v322_v61, %v288_v26  ;;  %v337_v37 = vadd.f32 %v320_v62, %v287_v27 }
  0xe8   : > { %v364_v5 = vpop.permute.xlu1 %363  ;;  %v362_v6 = vpop.permute.xlu0 %361 }
  0xe9   : > { %v384_v38 = vadd.f32 %v364_v5, %v334_v28  ;;  %v383_v39 = vadd.f32 %v362_v6, %v333_v31 }
  0xec   : > { %v368_v1 = vpop.permute.xlu1 %367  ;;  %v366_v19 = vpop.permute.xlu0 %365 }
  0xed   : > { %v386_v57 = vadd.f32 %v368_v1, %v336_v32  ;;  %v385_v61 = vadd.f32 %v366_v19, %v335_v35 }
  0xf0   : > { %v410_v29 = vpop.permute.xlu1 %409  ;;  %v408_v30 = vpop.permute.xlu0 %407 }
  0xf1   : > { %v432_v33 = vadd.f32 %v410_v29, %v382_v17  ;;  %v431_v34 = vadd.f32 %v408_v30, %v381_v24 }
  0xf3   : > { %v452_v40 = vmul.f32 %v1141_v20, %v432_v33  ;;  %v499_v41 = vmul.f32 %v1143_v0, %v432_v33  ;;  %v546_v42 = vmul.f32 %v1145_v9, %v432_v33  ;;  %v442_v43 = vmul.f32 %v1139_v4, %v432_v33 }
  0xf4   : > { %v593_v44 = vmul.f32 %v1147_v22, %v432_v33  ;;  %v451_v45 = vmul.f32 %v1141_v20, %v431_v34  ;;  %v498_v46 = vmul.f32 %v1143_v0, %v431_v34  ;;  %v372_v47 = vpop.permute.xlu1 %371  ;;  %v370_v48 = vpop.permute.xlu0 %369  ;;  %v545_v52 = vmul.f32 %v1145_v9, %v431_v34 }
  0xf5   : > { %v469_v49 = vrot.slane %v452_v40, 1  ;;  %v516_v50 = vrot.slane %v499_v41, 2  ;;  %v563_v51 = vrot.slane %v546_v42, 3  ;;  %v592_v56 = vmul.f32 %v1147_v22, %v431_v34 }
  0xf6   : > { %v610_v53 = vrot.slane %v593_v44, 4  ;;  %v468_v54 = vrot.slane %v451_v45, 1  ;;  %v515_v55 = vrot.slane %v498_v46, 2  ;;  %v441_v59 = vmul.f32 %v1139_v4, %v431_v34 }
  0xf7   : > { %v489_v58 = vadd.f32 %v469_v49, %v442_v43  ;;  %v562_v60 = vrot.slane %v545_v52, 3  ;;  %v609_v2 = vrot.slane %v592_v56, 4  ;;  %v388_v14 = vadd.f32 %v372_v47, %v338_v36 }
  0xf8   : > { %v470_v62 = vsel %vm467_vm0, %v468_v54, %v469_v49  ;;  %v517_v63 = vsel %vm514_vm1, %v515_v55, %v516_v50  ;;  %v414_v5 = vpop.permute.xlu1 %413  ;;  %v412_v6 = vpop.permute.xlu0 %411  ;;  %v1174_v15 = vadd.f32 %v370_v48, %v337_v37 }
  0xf9   : > { %v536_v7 = vadd.f32 %v516_v50, %v489_v58  ;;  %v488_v8 = vadd.f32 %v470_v62, %v441_v59  ;;  %v564_v11 = vsel %vm561_vm2, %v562_v60, %v563_v51  ;;  %v434_v12 = vadd.f32 %v414_v5, %v384_v38 }
  0xfa   : > { %v611_v13 = vsel %vm608_vm3, %v609_v2, %v610_v53  ;;  %v433_v18 = vadd.f32 %v412_v6, %v383_v39 }
  0xfb   : > { %v583_v1 = vadd.f32 %v563_v51, %v536_v7  ;;  %v535_v19 = vadd.f32 %v517_v63, %v488_v8  ;;  %v444_v3 = vmul.f32 %v1139_v4, %v434_v12  ;;  %v454_v21 = vmul.f32 %v1141_v20, %v434_v12 }
  0xfc   : > { %v501_v23 = vmul.f32 %v1143_v0, %v434_v12  ;;  %v548_v10 = vmul.f32 %v1145_v9, %v434_v12  ;;  %v595_v16 = vmul.f32 %v1147_v22, %v434_v12  ;;  %v443_v17 = vmul.f32 %v1139_v4, %v433_v18  ;;  %v418_v24 = vpop.permute.xlu1 %417  ;;  %v416_v29 = vpop.permute.xlu0 %415 }
  0xfd   : > { %v630_v25 = vadd.f32 %v610_v53, %v583_v1  ;;  %v582_v26 = vadd.f32 %v564_v11, %v535_v19  ;;  %v472_v27 = vrot.slane %v454_v21, 1  ;;  %v453_v28 = vmul.f32 %v1141_v20, %v433_v18 }
  0xfe   : > { %v519_v30 = vrot.slane %v501_v23, 2  ;;  %v566_v31 = vrot.slane %v548_v10, 3  ;;  %v613_v32 = vrot.slane %v595_v16, 4  ;;  %v500_v33 = vmul.f32 %v1143_v0, %v433_v18 }
  0xff   : > { %640 = vst.msk [vmem:[%s1181_s10 + $0x8] sm:$0xf] %vm639_vm4, %v630_v25  ;;  %v629_v34 = vadd.f32 %v611_v13, %v582_v26  ;;  %v491_v35 = vadd.f32 %v472_v27, %v444_v3  ;;  %v471_v36 = vrot.slane %v453_v28, 1  ;;  %v547_v37 = vmul.f32 %v1145_v9, %v433_v18 }
 0x100   : > { %v518_v38 = vrot.slane %v500_v33, 2  ;;  %v594_v39 = vmul.f32 %v1147_v22, %v433_v18  ;;  %v436_v40 = vadd.f32 %v418_v24, %v386_v57  ;;  %v435_v41 = vadd.f32 %v416_v29, %v385_v61  ;;  %v422_v42 = vpop.permute.xlu1 %421  ;;  %v420_v25 = vpop.permute.xlu0 %419 }
 0x101   : > { %638 = vst.msk [vmem:[%s1181_s10] sm:$0xff] %vm637_vm5, %v629_v34  ;;  %v538_v43 = vadd.f32 %v519_v30, %v491_v35  ;;  %v473_v44 = vsel %vm467_vm0, %v471_v36, %v472_v27  ;;  %v565_v45 = vrot.slane %v547_v37, 3  ;;  %v438_v46 = vadd.f32 %v422_v42, %v388_v14 }
 0x102   : > { %v490_v47 = vadd.f32 %v473_v44, %v443_v17  ;;  %v520_v48 = vsel %vm514_vm1, %v518_v38, %v519_v30  ;;  %v612_v49 = vrot.slane %v594_v39, 4  ;;  %v446_v50 = vmul.f32 %v1139_v4, %v436_v40 }
 0x103   : > { %v585_v51 = vadd.f32 %v566_v31, %v538_v43  ;;  %v567_v52 = vsel %vm561_vm2, %v565_v45, %v566_v31  ;;  %v456_v53 = vmul.f32 %v1141_v20, %v436_v40  ;;  %v503_v54 = vmul.f32 %v1143_v0, %v436_v40 }
 0x104   : > { %v537_v55 = vadd.f32 %v520_v48, %v490_v47  ;;  %v614_v56 = vsel %vm608_vm3, %v612_v49, %v613_v32  ;;  %v550_v57 = vmul.f32 %v1145_v9, %v436_v40  ;;  %v597_v58 = vmul.f32 %v1147_v22, %v436_v40 }
 0x105   : > { %v632_v59 = vadd.f32 %v613_v32, %v585_v51  ;;  %v475_v60 = vrot.slane %v456_v53, 1  ;;  %v522_v61 = vrot.slane %v503_v54, 2  ;;  %v445_v62 = vmul.f32 %v1139_v4, %v435_v41 }
 0x106   : > { %v584_v63 = vadd.f32 %v567_v52, %v537_v55  ;;  %v569_v2 = vrot.slane %v550_v57, 3  ;;  %v616_v5 = vrot.slane %v597_v58, 4  ;;  %v455_v6 = vmul.f32 %v1141_v20, %v435_v41 }
 0x107   : > { %642 = vst.msk [vmem:[%s1181_s10 + $0x18] sm:$0xf] %vm639_vm4, %v632_v59  ;;  %v493_v7 = vadd.f32 %v475_v60, %v446_v50  ;;  %v502_v8 = vmul.f32 %v1143_v0, %v435_v41  ;;  %v549_v11 = vmul.f32 %v1145_v9, %v435_v41  ;;  %v596_v12 = vmul.f32 %v1147_v22, %v435_v41 }
 0x108   : > { %v631_v13 = vadd.f32 %v614_v56, %v584_v63  ;;  %v474_v14 = vrot.slane %v455_v6, 1  ;;  %v448_v18 = vmul.f32 %v1139_v4, %v438_v46  ;;  %v458_v1 = vmul.f32 %v1141_v20, %v438_v46 }
 0x109   : > { %v540_v19 = vadd.f32 %v522_v61, %v493_v7  ;;  %v521_v3 = vrot.slane %v502_v8, 2  ;;  %v568_v21 = vrot.slane %v549_v11, 3  ;;  %v615_v23 = vrot.slane %v596_v12, 4 }
 0x10a   : > { %641 = vst.msk [vmem:[%s1181_s10 + $0x10] sm:$0xff] %vm637_vm5, %v631_v13  ;;  %v476_v10 = vsel %vm467_vm0, %v474_v14, %v475_v60  ;;  %v478_v16 = vrot.slane %v458_v1, 1  ;;  %v505_v17 = vmul.f32 %v1143_v0, %v438_v46  ;;  %v552_v24 = vmul.f32 %v1145_v9, %v438_v46 }
 0x10b   : > { %v587_v26 = vadd.f32 %v569_v2, %v540_v19  ;;  %v492_v27 = vadd.f32 %v476_v10, %v445_v62  ;;  %v523_v28 = vsel %vm514_vm1, %v521_v3, %v522_v61  ;;  %v570_v29 = vsel %vm561_vm2, %v568_v21, %v569_v2 }
 0x10c   : > { %v617_v30 = vsel %vm608_vm3, %v615_v23, %v616_v5  ;;  %v495_v31 = vadd.f32 %v478_v16, %v448_v18  ;;  %v525_v32 = vrot.slane %v505_v17, 2  ;;  %v599_v35 = vmul.f32 %v1147_v22, %v438_v46 }
 0x10d   : > { %v634_v33 = vadd.f32 %v616_v5, %v587_v26  ;;  %v539_v34 = vadd.f32 %v523_v28, %v492_v27  ;;  %v437_v36 = vadd.f32 %v420_v25, %v1174_v15  ;;  %v572_v38 = vrot.slane %v552_v24, 3 }
 0x10e   : > { %v542_v37 = vadd.f32 %v525_v32, %v495_v31  ;;  %v619_v40 = vrot.slane %v599_v35, 4 }
 0x10f   : > { %644 = vst.msk [vmem:[%s1181_s10 + $0x28] sm:$0xf] %vm639_vm4, %v634_v33  ;;  %v586_v39 = vadd.f32 %v570_v29, %v539_v34  ;;  %v457_v41 = vmul.f32 %v1141_v20, %v437_v36  ;;  %v504_v43 = vmul.f32 %v1143_v0, %v437_v36  ;;  %v551_v44 = vmul.f32 %v1145_v9, %v437_v36 }
 0x110   : > { %v589_v42 = vadd.f32 %v572_v38, %v542_v37  ;;  %v598_v45 = vmul.f32 %v1147_v22, %v437_v36  ;;  %v447_v15 = vmul.f32 %v1139_v4, %v437_v36 }
 0x111   : > { %v633_v46 = vadd.f32 %v617_v30, %v586_v39  ;;  %v477_v47 = vrot.slane %v457_v41, 1  ;;  %v524_v49 = vrot.slane %v504_v43, 2  ;;  %v571_v50 = vrot.slane %v551_v44, 3 }
 0x112   : > { %v636_v48 = vadd.f32 %v619_v40, %v589_v42  ;;  %v618_v51 = vrot.slane %v598_v45, 4 }
 0x113   : > { %643 = vst.msk [vmem:[%s1181_s10 + $0x20] sm:$0xff] %vm637_vm5, %v633_v46  ;;  %v479_v20 = vsel %vm467_vm0, %v477_v47, %v478_v16  ;;  %v526_v9 = vsel %vm514_vm1, %v524_v49, %v525_v32  ;;  %v573_v22 = vsel %vm561_vm2, %v571_v50, %v572_v38 }
 0x114   : > { %646 = vst.msk [vmem:[%s1181_s10 + $0x38] sm:$0xf] %vm639_vm4, %v636_v48  ;;  %v494_v0 = vadd.f32 %v479_v20, %v447_v15  ;;  %v620_v52 = vsel %vm608_vm3, %v618_v51, %v619_v40 }
 0x116   : > { %v541_v4 = vadd.f32 %v526_v9, %v494_v0 }
 0x118   : > { %v588_v53 = vadd.f32 %v573_v22, %v541_v4 }
 0x11a   : > { %v635_v54 = vadd.f32 %v620_v52, %v588_v53 }
 0x11c   : > { %645 = vst.msk [vmem:[%s1181_s10 + $0x30] sm:$0xff] %vm637_vm5, %v635_v54 }
 0x11d PF: > { %p15_p9 = scmp.ge.s32.totalorder %s983_s17, 4   ;;  %s1269_s12 = smov %s924_s13 }
 0x11e   : > { %s1270_s13 = smov %s928_s14  ;;  %s1271_s14 = smov %s993_s20 }
 0x11f   : > { %s1272_s15 = smov %s983_s17  ;;  %17 = sbr.rel (!%p15_p9) target bundleno = 5 (0x5), region = 82 }
 0x124   :  { %671 = vsyncpa [#allocation3], 1 }
 0x125   :  { %673 = vsyncpa [#allocation3 + $0x1], 1 }
 0x126   :  { %674 = vsyncpa [#allocation4], 1 }
 0x127   :  { %676 = vsyncpa [#allocation4 + $0x1], 1 }
 0x128   :  { %677 = vsyncpa [#allocation5], 1 }
 0x129   :  { %679 = vsyncpa [#allocation5 + $0x1], 1 }

</bundles_post_ra>
